<compile_context>
chip_gen: v6e
topology: v6e:2x2x1
jax: 0.10.0
libtpu: 0.0.40
codegen_flags: <defaults>
</compile_context>

<pallas_src>
import jax
import jax.numpy as jnp
from jax.experimental import pallas as pl
from jax.experimental.pallas import tpu as pltpu

NEG_SLOPE = 0.01  # torch.nn.functional.leaky_relu default


def _leaky_relu(x):
    return jnp.where(x > 0, x, NEG_SLOPE * x)


def ddrqn_kernel(x_ref,       # (T, B, in_dim)   time-major
                 w1_ref,      # (in_dim, M0)
                 w2_ref,      # (M0, M0)
                 wih_ref,     # (M0, 3H)  fused [r|z|n]
                 whh_ref,     # (H, 3H)   fused [r|z|n]
                 w3_ref,      # (H, M1)
                 w4_ref,      # (M1, out)
                 bias_ref,    # (8, Wpad) packed bias rows
                 h0_ref,      # (B, H)
                 out_ref,     # (T, B, out)  time-major
                 hout_ref):   # (B, H)
    T, B, in_dim = x_ref.shape
    M0 = w1_ref.shape[1]
    H = h0_ref.shape[1]
    M1 = w3_ref.shape[1]
    out_dim = out_ref.shape[-1]

    # ---- Unpack the single packed bias array (one DMA instead of six) ----
    bias = bias_ref[...]
    b1 = bias[0:1, :M0]
    b2 = bias[1:2, :M0]
    gb = bias[2:3, :3 * H]     # b_ih + [b_hr, b_hz, 0]   (r/z hidden biases folded)
    bnh = bias[3:4, :H]        # b_hn (must stay inside r * (...))
    b3 = bias[4:5, :M1]
    b4 = bias[5:6, :out_dim]

    # ---- Batched, time-invariant part (hoisted out of the recurrence) ----
    x_flat = x_ref[...].reshape(T * B, in_dim)          # time-major rows
    a1 = _leaky_relu(jnp.dot(x_flat, w1_ref[...],
                             preferred_element_type=jnp.float32) + b1)
    a2 = _leaky_relu(jnp.dot(a1, w2_ref[...],
                             preferred_element_type=jnp.float32) + b2)

    # One fused gate-input matmul for the whole sequence: (T*B, 3H), time-major.
    gx = jnp.dot(a2, wih_ref[...],
                 preferred_element_type=jnp.float32) + gb

    whh = whh_ref[...]
    bnh_b = jnp.broadcast_to(bnh, (B, H))                # hoisted broadcast

    # ---- Serial GRU recurrence (fully unrolled; one MXU push per step) ----
    h = h0_ref[...]
    hs = []
    for t in range(T):
        gxt = gx[t * B:(t + 1) * B, :]                   # contiguous leading-axis slice
        gh = jnp.dot(h, whh, preferred_element_type=jnp.float32)   # (B, 3H) fused
        r = jax.nn.sigmoid(gxt[:, :H] + gh[:, :H])
        z = jax.nn.sigmoid(gxt[:, H:2 * H] + gh[:, H:2 * H])
        n = jnp.tanh(gxt[:, 2 * H:] + r * (gh[:, 2 * H:] + bnh_b))
        h = (1.0 - z) * n + z * h
        hs.append(h)                                     # kept in registers, no VMEM scratch

    hout_ref[...] = h

    # ---- Batched output head (fc3/fc4), single full-block store ----
    h_all = jnp.stack(hs, axis=0).reshape(T * B, H)      # (T*B, H), time-major
    y = _leaky_relu(jnp.dot(h_all, w3_ref[...],
                            preferred_element_type=jnp.float32) + b3)
    y = jnp.dot(y, w4_ref[...],
                preferred_element_type=jnp.float32) + b4
    out_ref[...] = y.reshape(T, B, out_dim)


def init_params(key, input_dim, output_dim,
                dec_mlp_layer_size=(32, 32), dec_rnn_h_size=32):
    """Deterministic parameter init mirroring the PyTorch module's __init__."""
    m0, m1 = dec_mlp_layer_size
    H = dec_rnn_h_size
    keys = jax.random.split(key, 10)

    def xavier_uniform(k, fan_in, fan_out, gain):
        a = gain * jnp.sqrt(6.0 / (fan_in + fan_out))
        # stored as (fan_in, fan_out) so the kernel does x @ W
        return jax.random.uniform(k, (fan_in, fan_out), jnp.float32, -a, a)

    gain_lrelu = jnp.sqrt(2.0 / (1.0 + NEG_SLOPE ** 2))  # calculate_gain('leaky_relu')
    gain_lin = 1.0

    params = {
        "w1": xavier_uniform(keys[0], input_dim, m0, gain_lrelu),
        "b1": jnp.zeros((1, m0), jnp.float32),
        "w2": xavier_uniform(keys[1], m0, m0, gain_lrelu),
        "b2": jnp.zeros((1, m0), jnp.float32),
        "w3": xavier_uniform(keys[2], H, m1, gain_lrelu),
        "b3": jnp.zeros((1, m1), jnp.float32),
        "w4": xavier_uniform(keys[3], m1, output_dim, gain_lin),
        "b4": jnp.zeros((1, output_dim), jnp.float32),
    }
    # GRU params: PyTorch inits uniform(-1/sqrt(H), 1/sqrt(H)); stored transposed.
    s = 1.0 / jnp.sqrt(jnp.float32(H))
    params["wih"] = jax.random.uniform(keys[4], (m0, 3 * H), jnp.float32, -s, s)
    params["bih"] = jax.random.uniform(keys[5], (1, 3 * H), jnp.float32, -s, s)
    params["whh"] = jax.random.uniform(keys[6], (H, 3 * H), jnp.float32, -s, s)
    params["bhh"] = jax.random.uniform(keys[7], (1, 3 * H), jnp.float32, -s, s)
    return params


def _pack_biases(params):
    """Pack all bias rows into one (8, Wpad) array -> a single kernel input DMA.

    Row layout: 0:b1, 1:b2, 2:(b_ih + [b_hr,b_hz,0]), 3:b_hn, 4:b3, 5:b4, 6-7:pad.
    """
    H = params["whh"].shape[0]
    bih, bhh = params["bih"], params["bhh"]
    gb = bih + jnp.concatenate(
        [bhh[:, :2 * H], jnp.zeros((1, H), jnp.float32)], axis=1)   # (1, 3H)
    bnh = bhh[:, 2 * H:]                                            # (1, H)
    rows = [params["b1"], params["b2"], gb, bnh, params["b3"], params["b4"]]
    wmax = max(r.shape[1] for r in rows)
    wpad = ((wmax + 127) // 128) * 128
    packed = jnp.concatenate(
        [jnp.pad(r, ((0, 0), (0, wpad - r.shape[1]))) for r in rows], axis=0)
    return jnp.pad(packed, ((0, 8 - packed.shape[0]), (0, 0)))      # (8, wpad)


@jax.jit
def ddrqn_forward(x, params, h0=None):
    """x: (B, T, input_dim) float32 (batch_first, like the PyTorch module)."""
    B, T, _ = x.shape
    H = params["whh"].shape[0]
    out_dim = params["w4"].shape[1]

    h0_2d = jnp.zeros((B, H), jnp.float32) if h0 is None else h0.reshape(B, H)
    bias_pack = _pack_biases(params)

    # Wrapper-side layout plumbing: kernel runs time-major so the per-step
    # gate-input read inside the serial recurrence is a leading-axis slice.
    x_tm = jnp.transpose(x, (1, 0, 2))                   # (T, B, in)

    vmem = pl.BlockSpec(memory_space=pltpu.MemorySpace.VMEM)
    args = (x_tm, params["w1"], params["w2"], params["wih"], params["whh"],
            params["w3"], params["w4"], bias_pack, h0_2d)

    # TODO(synk): when B (or B*T) grows, add a grid over the batch axis with
    # dimension_semantics=("parallel",) so v7x's two TensorCores are both used
    # and x/out get pipelined BlockSpecs. At current toy sizes a grid-free
    # single shot is fastest (everything fits in VMEM, <100 KiB resident).
    out_tm, h_out = pl.pallas_call(
        ddrqn_kernel,
        out_shape=(jax.ShapeDtypeStruct((T, B, out_dim), jnp.float32),
                   jax.ShapeDtypeStruct((B, H), jnp.float32)),
        in_specs=[vmem] * len(args),
        out_specs=(vmem, vmem),
    )(*args)

    out = jnp.transpose(out_tm, (1, 0, 2))               # (B, T, out)
    return out, h_out[None]                              # (B, T, out), (1, B, H)


def ddrqn_reference(x, params, h0=None):
    """Pure-JAX reference of the PyTorch forward, for validation."""
    B, T, _ = x.shape
    H = params["whh"].shape[0]
    h = jnp.zeros((B, H), jnp.float32) if h0 is None else h0.reshape(B, H)
    a = _leaky_relu(x @ params["w1"] + params["b1"])
    a = _leaky_relu(a @ params["w2"] + params["b2"])
    outs = []
    for t in range(T):
        gx = a[:, t, :] @ params["wih"] + params["bih"]
        gh = h @ params["whh"] + params["bhh"]
        r = jax.nn.sigmoid(gx[:, :H] + gh[:, :H])
        z = jax.nn.sigmoid(gx[:, H:2 * H] + gh[:, H:2 * H])
        n = jnp.tanh(gx[:, 2 * H:] + r * gh[:, 2 * H:])
        h = (1.0 - z) * n + z * h
        y = _leaky_relu(h @ params["w3"] + params["b3"]) @ params["w4"] + params["b4"]
        outs.append(y)
    return jnp.stack(outs, axis=1), h[None]


if __name__ == "__main__":
    key = jax.random.PRNGKey(0)
    k_param, k_x, k_h = jax.random.split(key, 3)

    B, T, input_dim, output_dim, H = 4, 8, 16, 8, 32
    params = init_params(k_param, input_dim, output_dim,
                         dec_mlp_layer_size=(32, 32), dec_rnn_h_size=H)

    x = jax.random.normal(k_x, (B, T, input_dim), jnp.float32)

    # h=None path (PyTorch default)
    q, h = ddrqn_forward(x, params)
    q = jax.block_until_ready(q)
    h = jax.block_until_ready(h)
    q_ref, h_ref = ddrqn_reference(x, params)
    assert q.shape == (B, T, output_dim) and h.shape == (1, B, H)
    assert jnp.allclose(q, q_ref, atol=1e-5, rtol=1e-5)
    assert jnp.allclose(h, h_ref, atol=1e-5, rtol=1e-5)

    # explicit initial hidden state path
    h0 = 0.1 * jax.random.normal(k_h, (1, B, H), jnp.float32)
    q2, h2 = ddrqn_forward(x, params, h0)
    q2 = jax.block_until_ready(q2)
    h2 = jax.block_until_ready(h2)
    q2_ref, h2_ref = ddrqn_reference(x, params, h0)
    assert jnp.allclose(q2, q2_ref, atol=1e-5, rtol=1e-5)
    assert jnp.allclose(h2, h2_ref, atol=1e-5, rtol=1e-5)

    print("KERNEL_OK")
</pallas_src>

<mosaic_0001>
module attributes {stable_mosaic.version = 11 : i64} {
  func.func @ddrqn_kernel(%arg0: memref<8x4x16xf32, #tpu.memory_space<vmem>>, %arg1: memref<16x32xf32, #tpu.memory_space<vmem>>, %arg2: memref<32x32xf32, #tpu.memory_space<vmem>>, %arg3: memref<32x96xf32, #tpu.memory_space<vmem>>, %arg4: memref<32x96xf32, #tpu.memory_space<vmem>>, %arg5: memref<32x32xf32, #tpu.memory_space<vmem>>, %arg6: memref<32x8xf32, #tpu.memory_space<vmem>>, %arg7: memref<8x128xf32, #tpu.memory_space<vmem>>, %arg8: memref<4x32xf32, #tpu.memory_space<vmem>>, %arg9: memref<8x4x8xf32, #tpu.memory_space<vmem>>, %arg10: memref<4x32xf32, #tpu.memory_space<vmem>>) attributes {dimension_semantics = [], scalar_prefetch = 0 : i64, scratch_operands = 0 : i64, tpu.core_type = #tpu.core_type<tc>} {
    %c0 = arith.constant 0 : index
    %c0_0 = arith.constant 0 : index
    %0 = vector.load %arg7[%c0, %c0_0] : memref<8x128xf32, #tpu.memory_space<vmem>>, vector<8x128xf32>
    %1 = vector.extract_strided_slice %0 {offsets = [0, 0], sizes = [1, 32], strides = [1, 1]} : vector<8x128xf32> to vector<1x32xf32>
    %2 = vector.extract_strided_slice %0 {offsets = [1, 0], sizes = [1, 32], strides = [1, 1]} : vector<8x128xf32> to vector<1x32xf32>
    %3 = vector.extract_strided_slice %0 {offsets = [2, 0], sizes = [1, 96], strides = [1, 1]} : vector<8x128xf32> to vector<1x96xf32>
    %4 = vector.extract_strided_slice %0 {offsets = [3, 0], sizes = [1, 32], strides = [1, 1]} : vector<8x128xf32> to vector<1x32xf32>
    %5 = vector.extract_strided_slice %0 {offsets = [4, 0], sizes = [1, 32], strides = [1, 1]} : vector<8x128xf32> to vector<1x32xf32>
    %6 = vector.extract_strided_slice %0 {offsets = [5, 0], sizes = [1, 8], strides = [1, 1]} : vector<8x128xf32> to vector<1x8xf32>
    %c0_1 = arith.constant 0 : index
    %c0_2 = arith.constant 0 : index
    %c0_3 = arith.constant 0 : index
    %7 = vector.load %arg0[%c0_1, %c0_2, %c0_3] : memref<8x4x16xf32, #tpu.memory_space<vmem>>, vector<8x4x16xf32>
    %8 = vector.shape_cast %7 : vector<8x4x16xf32> to vector<32x16xf32>
    %c0_4 = arith.constant 0 : index
    %c0_5 = arith.constant 0 : index
    %9 = vector.load %arg1[%c0_4, %c0_5] : memref<16x32xf32, #tpu.memory_space<vmem>>, vector<16x32xf32>
    %cst = arith.constant dense<0.000000e+00> : vector<32x32xf32>
    %10 = tpu.matmul %8, %9, %cst {dimension_numbers = #tpu.dot_dimension_numbers<[1], [0], [0], [1], [0, 0, 1, 1], [], []>} : vector<32x16xf32>, vector<16x32xf32>, vector<32x32xf32> -> vector<32x32xf32>
    %11 = vector.broadcast %1 : vector<1x32xf32> to vector<32x32xf32>
    %12 = arith.addf %10, %11 : vector<32x32xf32>
    %cst_6 = arith.constant 0.000000e+00 : f32
    %13 = vector.broadcast %cst_6 : f32 to vector<32x32xf32>
    %14 = arith.cmpf ogt, %12, %13 : vector<32x32xf32>
    %cst_7 = arith.constant 0.00999999977 : f32
    %15 = vector.broadcast %cst_7 : f32 to vector<32x32xf32>
    %16 = arith.mulf %15, %12 : vector<32x32xf32>
    %17 = arith.select %14, %12, %16 : vector<32x32xi1>, vector<32x32xf32>
    %c0_8 = arith.constant 0 : index
    %c0_9 = arith.constant 0 : index
    %18 = vector.load %arg2[%c0_8, %c0_9] : memref<32x32xf32, #tpu.memory_space<vmem>>, vector<32x32xf32>
    %cst_10 = arith.constant dense<0.000000e+00> : vector<32x32xf32>
    %19 = tpu.matmul %17, %18, %cst_10 {dimension_numbers = #tpu.dot_dimension_numbers<[1], [0], [0], [1], [0, 0, 1, 1], [], []>} : vector<32x32xf32>, vector<32x32xf32>, vector<32x32xf32> -> vector<32x32xf32>
    %20 = vector.broadcast %2 : vector<1x32xf32> to vector<32x32xf32>
    %21 = arith.addf %19, %20 : vector<32x32xf32>
    %cst_11 = arith.constant 0.000000e+00 : f32
    %22 = vector.broadcast %cst_11 : f32 to vector<32x32xf32>
    %23 = arith.cmpf ogt, %21, %22 : vector<32x32xf32>
    %cst_12 = arith.constant 0.00999999977 : f32
    %24 = vector.broadcast %cst_12 : f32 to vector<32x32xf32>
    %25 = arith.mulf %24, %21 : vector<32x32xf32>
    %26 = arith.select %23, %21, %25 : vector<32x32xi1>, vector<32x32xf32>
    %c0_13 = arith.constant 0 : index
    %c0_14 = arith.constant 0 : index
    %27 = vector.load %arg3[%c0_13, %c0_14] : memref<32x96xf32, #tpu.memory_space<vmem>>, vector<32x96xf32>
    %cst_15 = arith.constant dense<0.000000e+00> : vector<32x96xf32>
    %28 = tpu.matmul %26, %27, %cst_15 {dimension_numbers = #tpu.dot_dimension_numbers<[1], [0], [0], [1], [0, 0, 1, 1], [], []>} : vector<32x32xf32>, vector<32x96xf32>, vector<32x96xf32> -> vector<32x96xf32>
    %29 = vector.broadcast %3 : vector<1x96xf32> to vector<32x96xf32>
    %30 = arith.addf %28, %29 : vector<32x96xf32>
    %c0_16 = arith.constant 0 : index
    %c0_17 = arith.constant 0 : index
    %31 = vector.load %arg4[%c0_16, %c0_17] : memref<32x96xf32, #tpu.memory_space<vmem>>, vector<32x96xf32>
    %32 = vector.shape_cast %4 : vector<1x32xf32> to vector<1x32xf32>
    %33 = vector.broadcast %32 : vector<1x32xf32> to vector<4x32xf32>
    %c0_18 = arith.constant 0 : index
    %c0_19 = arith.constant 0 : index
    %34 = vector.load %arg8[%c0_18, %c0_19] : memref<4x32xf32, #tpu.memory_space<vmem>>, vector<4x32xf32>
    %35 = vector.extract_strided_slice %30 {offsets = [0, 0], sizes = [4, 96], strides = [1, 1]} : vector<32x96xf32> to vector<4x96xf32>
    %cst_20 = arith.constant dense<0.000000e+00> : vector<4x96xf32>
    %36 = tpu.matmul %34, %31, %cst_20 {dimension_numbers = #tpu.dot_dimension_numbers<[1], [0], [0], [1], [0, 0, 1, 1], [], []>} : vector<4x32xf32>, vector<32x96xf32>, vector<4x96xf32> -> vector<4x96xf32>
    %37 = vector.extract_strided_slice %35 {offsets = [0, 0], sizes = [4, 32], strides = [1, 1]} : vector<4x96xf32> to vector<4x32xf32>
    %38 = vector.extract_strided_slice %36 {offsets = [0, 0], sizes = [4, 32], strides = [1, 1]} : vector<4x96xf32> to vector<4x32xf32>
    %39 = arith.addf %37, %38 : vector<4x32xf32>
    %40 = arith.negf %39 : vector<4x32xf32>
    %41 = math.exp %40 : vector<4x32xf32>
    %cst_21 = arith.constant 1.000000e+00 : f32
    %42 = vector.broadcast %cst_21 : f32 to vector<4x32xf32>
    %43 = arith.addf %42, %41 : vector<4x32xf32>
    %44 = arith.divf %42, %43 : vector<4x32xf32>
    %45 = vector.extract_strided_slice %35 {offsets = [0, 32], sizes = [4, 32], strides = [1, 1]} : vector<4x96xf32> to vector<4x32xf32>
    %46 = vector.extract_strided_slice %36 {offsets = [0, 32], sizes = [4, 32], strides = [1, 1]} : vector<4x96xf32> to vector<4x32xf32>
    %47 = arith.addf %45, %46 : vector<4x32xf32>
    %48 = arith.negf %47 : vector<4x32xf32>
    %49 = math.exp %48 : vector<4x32xf32>
    %cst_22 = arith.constant 1.000000e+00 : f32
    %50 = vector.broadcast %cst_22 : f32 to vector<4x32xf32>
    %51 = arith.addf %50, %49 : vector<4x32xf32>
    %52 = arith.divf %50, %51 : vector<4x32xf32>
    %53 = vector.extract_strided_slice %35 {offsets = [0, 64], sizes = [4, 32], strides = [1, 1]} : vector<4x96xf32> to vector<4x32xf32>
    %54 = vector.extract_strided_slice %36 {offsets = [0, 64], sizes = [4, 32], strides = [1, 1]} : vector<4x96xf32> to vector<4x32xf32>
    %55 = arith.addf %54, %33 : vector<4x32xf32>
    %56 = arith.mulf %44, %55 : vector<4x32xf32>
    %57 = arith.addf %53, %56 : vector<4x32xf32>
    %58 = math.tanh %57 : vector<4x32xf32>
    %cst_23 = arith.constant 1.000000e+00 : f32
    %59 = vector.broadcast %cst_23 : f32 to vector<4x32xf32>
    %60 = arith.subf %59, %52 : vector<4x32xf32>
    %61 = arith.mulf %60, %58 : vector<4x32xf32>
    %62 = arith.mulf %52, %34 : vector<4x32xf32>
    %63 = arith.addf %61, %62 : vector<4x32xf32>
    %64 = vector.extract_strided_slice %30 {offsets = [4, 0], sizes = [4, 96], strides = [1, 1]} : vector<32x96xf32> to vector<4x96xf32>
    %cst_24 = arith.constant dense<0.000000e+00> : vector<4x96xf32>
    %65 = tpu.matmul %63, %31, %cst_24 {dimension_numbers = #tpu.dot_dimension_numbers<[1], [0], [0], [1], [0, 0, 1, 1], [], []>} : vector<4x32xf32>, vector<32x96xf32>, vector<4x96xf32> -> vector<4x96xf32>
    %66 = vector.extract_strided_slice %64 {offsets = [0, 0], sizes = [4, 32], strides = [1, 1]} : vector<4x96xf32> to vector<4x32xf32>
    %67 = vector.extract_strided_slice %65 {offsets = [0, 0], sizes = [4, 32], strides = [1, 1]} : vector<4x96xf32> to vector<4x32xf32>
    %68 = arith.addf %66, %67 : vector<4x32xf32>
    %69 = arith.negf %68 : vector<4x32xf32>
    %70 = math.exp %69 : vector<4x32xf32>
    %cst_25 = arith.constant 1.000000e+00 : f32
    %71 = vector.broadcast %cst_25 : f32 to vector<4x32xf32>
    %72 = arith.addf %71, %70 : vector<4x32xf32>
    %73 = arith.divf %71, %72 : vector<4x32xf32>
    %74 = vector.extract_strided_slice %64 {offsets = [0, 32], sizes = [4, 32], strides = [1, 1]} : vector<4x96xf32> to vector<4x32xf32>
    %75 = vector.extract_strided_slice %65 {offsets = [0, 32], sizes = [4, 32], strides = [1, 1]} : vector<4x96xf32> to vector<4x32xf32>
    %76 = arith.addf %74, %75 : vector<4x32xf32>
    %77 = arith.negf %76 : vector<4x32xf32>
    %78 = math.exp %77 : vector<4x32xf32>
    %cst_26 = arith.constant 1.000000e+00 : f32
    %79 = vector.broadcast %cst_26 : f32 to vector<4x32xf32>
    %80 = arith.addf %79, %78 : vector<4x32xf32>
    %81 = arith.divf %79, %80 : vector<4x32xf32>
    %82 = vector.extract_strided_slice %64 {offsets = [0, 64], sizes = [4, 32], strides = [1, 1]} : vector<4x96xf32> to vector<4x32xf32>
    %83 = vector.extract_strided_slice %65 {offsets = [0, 64], sizes = [4, 32], strides = [1, 1]} : vector<4x96xf32> to vector<4x32xf32>
    %84 = arith.addf %83, %33 : vector<4x32xf32>
    %85 = arith.mulf %73, %84 : vector<4x32xf32>
    %86 = arith.addf %82, %85 : vector<4x32xf32>
    %87 = math.tanh %86 : vector<4x32xf32>
    %cst_27 = arith.constant 1.000000e+00 : f32
    %88 = vector.broadcast %cst_27 : f32 to vector<4x32xf32>
    %89 = arith.subf %88, %81 : vector<4x32xf32>
    %90 = arith.mulf %89, %87 : vector<4x32xf32>
    %91 = arith.mulf %81, %63 : vector<4x32xf32>
    %92 = arith.addf %90, %91 : vector<4x32xf32>
    %93 = vector.extract_strided_slice %30 {offsets = [8, 0], sizes = [4, 96], strides = [1, 1]} : vector<32x96xf32> to vector<4x96xf32>
    %cst_28 = arith.constant dense<0.000000e+00> : vector<4x96xf32>
    %94 = tpu.matmul %92, %31, %cst_28 {dimension_numbers = #tpu.dot_dimension_numbers<[1], [0], [0], [1], [0, 0, 1, 1], [], []>} : vector<4x32xf32>, vector<32x96xf32>, vector<4x96xf32> -> vector<4x96xf32>
    %95 = vector.extract_strided_slice %93 {offsets = [0, 0], sizes = [4, 32], strides = [1, 1]} : vector<4x96xf32> to vector<4x32xf32>
    %96 = vector.extract_strided_slice %94 {offsets = [0, 0], sizes = [4, 32], strides = [1, 1]} : vector<4x96xf32> to vector<4x32xf32>
    %97 = arith.addf %95, %96 : vector<4x32xf32>
    %98 = arith.negf %97 : vector<4x32xf32>
    %99 = math.exp %98 : vector<4x32xf32>
    %cst_29 = arith.constant 1.000000e+00 : f32
    %100 = vector.broadcast %cst_29 : f32 to vector<4x32xf32>
    %101 = arith.addf %100, %99 : vector<4x32xf32>
    %102 = arith.divf %100, %101 : vector<4x32xf32>
    %103 = vector.extract_strided_slice %93 {offsets = [0, 32], sizes = [4, 32], strides = [1, 1]} : vector<4x96xf32> to vector<4x32xf32>
    %104 = vector.extract_strided_slice %94 {offsets = [0, 32], sizes = [4, 32], strides = [1, 1]} : vector<4x96xf32> to vector<4x32xf32>
    %105 = arith.addf %103, %104 : vector<4x32xf32>
    %106 = arith.negf %105 : vector<4x32xf32>
    %107 = math.exp %106 : vector<4x32xf32>
    %cst_30 = arith.constant 1.000000e+00 : f32
    %108 = vector.broadcast %cst_30 : f32 to vector<4x32xf32>
    %109 = arith.addf %108, %107 : vector<4x32xf32>
    %110 = arith.divf %108, %109 : vector<4x32xf32>
    %111 = vector.extract_strided_slice %93 {offsets = [0, 64], sizes = [4, 32], strides = [1, 1]} : vector<4x96xf32> to vector<4x32xf32>
    %112 = vector.extract_strided_slice %94 {offsets = [0, 64], sizes = [4, 32], strides = [1, 1]} : vector<4x96xf32> to vector<4x32xf32>
    %113 = arith.addf %112, %33 : vector<4x32xf32>
    %114 = arith.mulf %102, %113 : vector<4x32xf32>
    %115 = arith.addf %111, %114 : vector<4x32xf32>
    %116 = math.tanh %115 : vector<4x32xf32>
    %cst_31 = arith.constant 1.000000e+00 : f32
    %117 = vector.broadcast %cst_31 : f32 to vector<4x32xf32>
    %118 = arith.subf %117, %110 : vector<4x32xf32>
    %119 = arith.mulf %118, %116 : vector<4x32xf32>
    %120 = arith.mulf %110, %92 : vector<4x32xf32>
    %121 = arith.addf %119, %120 : vector<4x32xf32>
    %122 = vector.extract_strided_slice %30 {offsets = [12, 0], sizes = [4, 96], strides = [1, 1]} : vector<32x96xf32> to vector<4x96xf32>
    %cst_32 = arith.constant dense<0.000000e+00> : vector<4x96xf32>
    %123 = tpu.matmul %121, %31, %cst_32 {dimension_numbers = #tpu.dot_dimension_numbers<[1], [0], [0], [1], [0, 0, 1, 1], [], []>} : vector<4x32xf32>, vector<32x96xf32>, vector<4x96xf32> -> vector<4x96xf32>
    %124 = vector.extract_strided_slice %122 {offsets = [0, 0], sizes = [4, 32], strides = [1, 1]} : vector<4x96xf32> to vector<4x32xf32>
    %125 = vector.extract_strided_slice %123 {offsets = [0, 0], sizes = [4, 32], strides = [1, 1]} : vector<4x96xf32> to vector<4x32xf32>
    %126 = arith.addf %124, %125 : vector<4x32xf32>
    %127 = arith.negf %126 : vector<4x32xf32>
    %128 = math.exp %127 : vector<4x32xf32>
    %cst_33 = arith.constant 1.000000e+00 : f32
    %129 = vector.broadcast %cst_33 : f32 to vector<4x32xf32>
    %130 = arith.addf %129, %128 : vector<4x32xf32>
    %131 = arith.divf %129, %130 : vector<4x32xf32>
    %132 = vector.extract_strided_slice %122 {offsets = [0, 32], sizes = [4, 32], strides = [1, 1]} : vector<4x96xf32> to vector<4x32xf32>
    %133 = vector.extract_strided_slice %123 {offsets = [0, 32], sizes = [4, 32], strides = [1, 1]} : vector<4x96xf32> to vector<4x32xf32>
    %134 = arith.addf %132, %133 : vector<4x32xf32>
    %135 = arith.negf %134 : vector<4x32xf32>
    %136 = math.exp %135 : vector<4x32xf32>
    %cst_34 = arith.constant 1.000000e+00 : f32
    %137 = vector.broadcast %cst_34 : f32 to vector<4x32xf32>
    %138 = arith.addf %137, %136 : vector<4x32xf32>
    %139 = arith.divf %137, %138 : vector<4x32xf32>
    %140 = vector.extract_strided_slice %122 {offsets = [0, 64], sizes = [4, 32], strides = [1, 1]} : vector<4x96xf32> to vector<4x32xf32>
    %141 = vector.extract_strided_slice %123 {offsets = [0, 64], sizes = [4, 32], strides = [1, 1]} : vector<4x96xf32> to vector<4x32xf32>
    %142 = arith.addf %141, %33 : vector<4x32xf32>
    %143 = arith.mulf %131, %142 : vector<4x32xf32>
    %144 = arith.addf %140, %143 : vector<4x32xf32>
    %145 = math.tanh %144 : vector<4x32xf32>
    %cst_35 = arith.constant 1.000000e+00 : f32
    %146 = vector.broadcast %cst_35 : f32 to vector<4x32xf32>
    %147 = arith.subf %146, %139 : vector<4x32xf32>
    %148 = arith.mulf %147, %145 : vector<4x32xf32>
    %149 = arith.mulf %139, %121 : vector<4x32xf32>
    %150 = arith.addf %148, %149 : vector<4x32xf32>
    %151 = vector.extract_strided_slice %30 {offsets = [16, 0], sizes = [4, 96], strides = [1, 1]} : vector<32x96xf32> to vector<4x96xf32>
    %cst_36 = arith.constant dense<0.000000e+00> : vector<4x96xf32>
    %152 = tpu.matmul %150, %31, %cst_36 {dimension_numbers = #tpu.dot_dimension_numbers<[1], [0], [0], [1], [0, 0, 1, 1], [], []>} : vector<4x32xf32>, vector<32x96xf32>, vector<4x96xf32> -> vector<4x96xf32>
    %153 = vector.extract_strided_slice %151 {offsets = [0, 0], sizes = [4, 32], strides = [1, 1]} : vector<4x96xf32> to vector<4x32xf32>
    %154 = vector.extract_strided_slice %152 {offsets = [0, 0], sizes = [4, 32], strides = [1, 1]} : vector<4x96xf32> to vector<4x32xf32>
    %155 = arith.addf %153, %154 : vector<4x32xf32>
    %156 = arith.negf %155 : vector<4x32xf32>
    %157 = math.exp %156 : vector<4x32xf32>
    %cst_37 = arith.constant 1.000000e+00 : f32
    %158 = vector.broadcast %cst_37 : f32 to vector<4x32xf32>
    %159 = arith.addf %158, %157 : vector<4x32xf32>
    %160 = arith.divf %158, %159 : vector<4x32xf32>
    %161 = vector.extract_strided_slice %151 {offsets = [0, 32], sizes = [4, 32], strides = [1, 1]} : vector<4x96xf32> to vector<4x32xf32>
    %162 = vector.extract_strided_slice %152 {offsets = [0, 32], sizes = [4, 32], strides = [1, 1]} : vector<4x96xf32> to vector<4x32xf32>
    %163 = arith.addf %161, %162 : vector<4x32xf32>
    %164 = arith.negf %163 : vector<4x32xf32>
    %165 = math.exp %164 : vector<4x32xf32>
    %cst_38 = arith.constant 1.000000e+00 : f32
    %166 = vector.broadcast %cst_38 : f32 to vector<4x32xf32>
    %167 = arith.addf %166, %165 : vector<4x32xf32>
    %168 = arith.divf %166, %167 : vector<4x32xf32>
    %169 = vector.extract_strided_slice %151 {offsets = [0, 64], sizes = [4, 32], strides = [1, 1]} : vector<4x96xf32> to vector<4x32xf32>
    %170 = vector.extract_strided_slice %152 {offsets = [0, 64], sizes = [4, 32], strides = [1, 1]} : vector<4x96xf32> to vector<4x32xf32>
    %171 = arith.addf %170, %33 : vector<4x32xf32>
    %172 = arith.mulf %160, %171 : vector<4x32xf32>
    %173 = arith.addf %169, %172 : vector<4x32xf32>
    %174 = math.tanh %173 : vector<4x32xf32>
    %cst_39 = arith.constant 1.000000e+00 : f32
    %175 = vector.broadcast %cst_39 : f32 to vector<4x32xf32>
    %176 = arith.subf %175, %168 : vector<4x32xf32>
    %177 = arith.mulf %176, %174 : vector<4x32xf32>
    %178 = arith.mulf %168, %150 : vector<4x32xf32>
    %179 = arith.addf %177, %178 : vector<4x32xf32>
    %180 = vector.extract_strided_slice %30 {offsets = [20, 0], sizes = [4, 96], strides = [1, 1]} : vector<32x96xf32> to vector<4x96xf32>
    %cst_40 = arith.constant dense<0.000000e+00> : vector<4x96xf32>
    %181 = tpu.matmul %179, %31, %cst_40 {dimension_numbers = #tpu.dot_dimension_numbers<[1], [0], [0], [1], [0, 0, 1, 1], [], []>} : vector<4x32xf32>, vector<32x96xf32>, vector<4x96xf32> -> vector<4x96xf32>
    %182 = vector.extract_strided_slice %180 {offsets = [0, 0], sizes = [4, 32], strides = [1, 1]} : vector<4x96xf32> to vector<4x32xf32>
    %183 = vector.extract_strided_slice %181 {offsets = [0, 0], sizes = [4, 32], strides = [1, 1]} : vector<4x96xf32> to vector<4x32xf32>
    %184 = arith.addf %182, %183 : vector<4x32xf32>
    %185 = arith.negf %184 : vector<4x32xf32>
    %186 = math.exp %185 : vector<4x32xf32>
    %cst_41 = arith.constant 1.000000e+00 : f32
    %187 = vector.broadcast %cst_41 : f32 to vector<4x32xf32>
    %188 = arith.addf %187, %186 : vector<4x32xf32>
    %189 = arith.divf %187, %188 : vector<4x32xf32>
    %190 = vector.extract_strided_slice %180 {offsets = [0, 32], sizes = [4, 32], strides = [1, 1]} : vector<4x96xf32> to vector<4x32xf32>
    %191 = vector.extract_strided_slice %181 {offsets = [0, 32], sizes = [4, 32], strides = [1, 1]} : vector<4x96xf32> to vector<4x32xf32>
    %192 = arith.addf %190, %191 : vector<4x32xf32>
    %193 = arith.negf %192 : vector<4x32xf32>
    %194 = math.exp %193 : vector<4x32xf32>
    %cst_42 = arith.constant 1.000000e+00 : f32
    %195 = vector.broadcast %cst_42 : f32 to vector<4x32xf32>
    %196 = arith.addf %195, %194 : vector<4x32xf32>
    %197 = arith.divf %195, %196 : vector<4x32xf32>
    %198 = vector.extract_strided_slice %180 {offsets = [0, 64], sizes = [4, 32], strides = [1, 1]} : vector<4x96xf32> to vector<4x32xf32>
    %199 = vector.extract_strided_slice %181 {offsets = [0, 64], sizes = [4, 32], strides = [1, 1]} : vector<4x96xf32> to vector<4x32xf32>
    %200 = arith.addf %199, %33 : vector<4x32xf32>
    %201 = arith.mulf %189, %200 : vector<4x32xf32>
    %202 = arith.addf %198, %201 : vector<4x32xf32>
    %203 = math.tanh %202 : vector<4x32xf32>
    %cst_43 = arith.constant 1.000000e+00 : f32
    %204 = vector.broadcast %cst_43 : f32 to vector<4x32xf32>
    %205 = arith.subf %204, %197 : vector<4x32xf32>
    %206 = arith.mulf %205, %203 : vector<4x32xf32>
    %207 = arith.mulf %197, %179 : vector<4x32xf32>
    %208 = arith.addf %206, %207 : vector<4x32xf32>
    %209 = vector.extract_strided_slice %30 {offsets = [24, 0], sizes = [4, 96], strides = [1, 1]} : vector<32x96xf32> to vector<4x96xf32>
    %cst_44 = arith.constant dense<0.000000e+00> : vector<4x96xf32>
    %210 = tpu.matmul %208, %31, %cst_44 {dimension_numbers = #tpu.dot_dimension_numbers<[1], [0], [0], [1], [0, 0, 1, 1], [], []>} : vector<4x32xf32>, vector<32x96xf32>, vector<4x96xf32> -> vector<4x96xf32>
    %211 = vector.extract_strided_slice %209 {offsets = [0, 0], sizes = [4, 32], strides = [1, 1]} : vector<4x96xf32> to vector<4x32xf32>
    %212 = vector.extract_strided_slice %210 {offsets = [0, 0], sizes = [4, 32], strides = [1, 1]} : vector<4x96xf32> to vector<4x32xf32>
    %213 = arith.addf %211, %212 : vector<4x32xf32>
    %214 = arith.negf %213 : vector<4x32xf32>
    %215 = math.exp %214 : vector<4x32xf32>
    %cst_45 = arith.constant 1.000000e+00 : f32
    %216 = vector.broadcast %cst_45 : f32 to vector<4x32xf32>
    %217 = arith.addf %216, %215 : vector<4x32xf32>
    %218 = arith.divf %216, %217 : vector<4x32xf32>
    %219 = vector.extract_strided_slice %209 {offsets = [0, 32], sizes = [4, 32], strides = [1, 1]} : vector<4x96xf32> to vector<4x32xf32>
    %220 = vector.extract_strided_slice %210 {offsets = [0, 32], sizes = [4, 32], strides = [1, 1]} : vector<4x96xf32> to vector<4x32xf32>
    %221 = arith.addf %219, %220 : vector<4x32xf32>
    %222 = arith.negf %221 : vector<4x32xf32>
    %223 = math.exp %222 : vector<4x32xf32>
    %cst_46 = arith.constant 1.000000e+00 : f32
    %224 = vector.broadcast %cst_46 : f32 to vector<4x32xf32>
    %225 = arith.addf %224, %223 : vector<4x32xf32>
    %226 = arith.divf %224, %225 : vector<4x32xf32>
    %227 = vector.extract_strided_slice %209 {offsets = [0, 64], sizes = [4, 32], strides = [1, 1]} : vector<4x96xf32> to vector<4x32xf32>
    %228 = vector.extract_strided_slice %210 {offsets = [0, 64], sizes = [4, 32], strides = [1, 1]} : vector<4x96xf32> to vector<4x32xf32>
    %229 = arith.addf %228, %33 : vector<4x32xf32>
    %230 = arith.mulf %218, %229 : vector<4x32xf32>
    %231 = arith.addf %227, %230 : vector<4x32xf32>
    %232 = math.tanh %231 : vector<4x32xf32>
    %cst_47 = arith.constant 1.000000e+00 : f32
    %233 = vector.broadcast %cst_47 : f32 to vector<4x32xf32>
    %234 = arith.subf %233, %226 : vector<4x32xf32>
    %235 = arith.mulf %234, %232 : vector<4x32xf32>
    %236 = arith.mulf %226, %208 : vector<4x32xf32>
    %237 = arith.addf %235, %236 : vector<4x32xf32>
    %238 = vector.extract_strided_slice %30 {offsets = [28, 0], sizes = [4, 96], strides = [1, 1]} : vector<32x96xf32> to vector<4x96xf32>
    %cst_48 = arith.constant dense<0.000000e+00> : vector<4x96xf32>
    %239 = tpu.matmul %237, %31, %cst_48 {dimension_numbers = #tpu.dot_dimension_numbers<[1], [0], [0], [1], [0, 0, 1, 1], [], []>} : vector<4x32xf32>, vector<32x96xf32>, vector<4x96xf32> -> vector<4x96xf32>
    %240 = vector.extract_strided_slice %238 {offsets = [0, 0], sizes = [4, 32], strides = [1, 1]} : vector<4x96xf32> to vector<4x32xf32>
    %241 = vector.extract_strided_slice %239 {offsets = [0, 0], sizes = [4, 32], strides = [1, 1]} : vector<4x96xf32> to vector<4x32xf32>
    %242 = arith.addf %240, %241 : vector<4x32xf32>
    %243 = arith.negf %242 : vector<4x32xf32>
    %244 = math.exp %243 : vector<4x32xf32>
    %cst_49 = arith.constant 1.000000e+00 : f32
    %245 = vector.broadcast %cst_49 : f32 to vector<4x32xf32>
    %246 = arith.addf %245, %244 : vector<4x32xf32>
    %247 = arith.divf %245, %246 : vector<4x32xf32>
    %248 = vector.extract_strided_slice %238 {offsets = [0, 32], sizes = [4, 32], strides = [1, 1]} : vector<4x96xf32> to vector<4x32xf32>
    %249 = vector.extract_strided_slice %239 {offsets = [0, 32], sizes = [4, 32], strides = [1, 1]} : vector<4x96xf32> to vector<4x32xf32>
    %250 = arith.addf %248, %249 : vector<4x32xf32>
    %251 = arith.negf %250 : vector<4x32xf32>
    %252 = math.exp %251 : vector<4x32xf32>
    %cst_50 = arith.constant 1.000000e+00 : f32
    %253 = vector.broadcast %cst_50 : f32 to vector<4x32xf32>
    %254 = arith.addf %253, %252 : vector<4x32xf32>
    %255 = arith.divf %253, %254 : vector<4x32xf32>
    %256 = vector.extract_strided_slice %238 {offsets = [0, 64], sizes = [4, 32], strides = [1, 1]} : vector<4x96xf32> to vector<4x32xf32>
    %257 = vector.extract_strided_slice %239 {offsets = [0, 64], sizes = [4, 32], strides = [1, 1]} : vector<4x96xf32> to vector<4x32xf32>
    %258 = arith.addf %257, %33 : vector<4x32xf32>
    %259 = arith.mulf %247, %258 : vector<4x32xf32>
    %260 = arith.addf %256, %259 : vector<4x32xf32>
    %261 = math.tanh %260 : vector<4x32xf32>
    %cst_51 = arith.constant 1.000000e+00 : f32
    %262 = vector.broadcast %cst_51 : f32 to vector<4x32xf32>
    %263 = arith.subf %262, %255 : vector<4x32xf32>
    %264 = arith.mulf %263, %261 : vector<4x32xf32>
    %265 = arith.mulf %255, %237 : vector<4x32xf32>
    %266 = arith.addf %264, %265 : vector<4x32xf32>
    %c0_52 = arith.constant 0 : index
    %c0_53 = arith.constant 0 : index
    %267 = vector.load %arg10[%c0_52, %c0_53] : memref<4x32xf32, #tpu.memory_space<vmem>>, vector<4x32xf32>
    tpu.vector_store %arg10[%c0_52, %c0_53], %266 {strides = array<i32>} : memref<4x32xf32, #tpu.memory_space<vmem>>, vector<4x32xf32>,
    %268 = vector.shape_cast %63 : vector<4x32xf32> to vector<1x4x32xf32>
    %269 = vector.shape_cast %92 : vector<4x32xf32> to vector<1x4x32xf32>
    %270 = vector.shape_cast %121 : vector<4x32xf32> to vector<1x4x32xf32>
    %271 = vector.shape_cast %150 : vector<4x32xf32> to vector<1x4x32xf32>
    %272 = vector.shape_cast %179 : vector<4x32xf32> to vector<1x4x32xf32>
    %273 = vector.shape_cast %208 : vector<4x32xf32> to vector<1x4x32xf32>
    %274 = vector.shape_cast %237 : vector<4x32xf32> to vector<1x4x32xf32>
    %275 = vector.shape_cast %266 : vector<4x32xf32> to vector<1x4x32xf32>
    %276 = tpu.concatenate %268, %269, %270, %271, %272, %273, %274, %275 in 0 : vector<1x4x32xf32>, vector<1x4x32xf32>, vector<1x4x32xf32>, vector<1x4x32xf32>, vector<1x4x32xf32>, vector<1x4x32xf32>, vector<1x4x32xf32>, vector<1x4x32xf32> -> vector<8x4x32xf32>
    %277 = vector.shape_cast %276 : vector<8x4x32xf32> to vector<32x32xf32>
    %c0_54 = arith.constant 0 : index
    %c0_55 = arith.constant 0 : index
    %278 = vector.load %arg5[%c0_54, %c0_55] : memref<32x32xf32, #tpu.memory_space<vmem>>, vector<32x32xf32>
    %cst_56 = arith.constant dense<0.000000e+00> : vector<32x32xf32>
    %279 = tpu.matmul %277, %278, %cst_56 {dimension_numbers = #tpu.dot_dimension_numbers<[1], [0], [0], [1], [0, 0, 1, 1], [], []>} : vector<32x32xf32>, vector<32x32xf32>, vector<32x32xf32> -> vector<32x32xf32>
    %280 = vector.broadcast %5 : vector<1x32xf32> to vector<32x32xf32>
    %281 = arith.addf %279, %280 : vector<32x32xf32>
    %cst_57 = arith.constant 0.000000e+00 : f32
    %282 = vector.broadcast %cst_57 : f32 to vector<32x32xf32>
    %283 = arith.cmpf ogt, %281, %282 : vector<32x32xf32>
    %cst_58 = arith.constant 0.00999999977 : f32
    %284 = vector.broadcast %cst_58 : f32 to vector<32x32xf32>
    %285 = arith.mulf %284, %281 : vector<32x32xf32>
    %286 = arith.select %283, %281, %285 : vector<32x32xi1>, vector<32x32xf32>
    %c0_59 = arith.constant 0 : index
    %c0_60 = arith.constant 0 : index
    %287 = vector.load %arg6[%c0_59, %c0_60] : memref<32x8xf32, #tpu.memory_space<vmem>>, vector<32x8xf32>
    %cst_61 = arith.constant dense<0.000000e+00> : vector<32x8xf32>
    %288 = tpu.matmul %286, %287, %cst_61 {dimension_numbers = #tpu.dot_dimension_numbers<[1], [0], [0], [1], [0, 0, 1, 1], [], []>} : vector<32x32xf32>, vector<32x8xf32>, vector<32x8xf32> -> vector<32x8xf32>
    %289 = vector.broadcast %6 : vector<1x8xf32> to vector<32x8xf32>
    %290 = arith.addf %288, %289 : vector<32x8xf32>
    %291 = vector.shape_cast %290 : vector<32x8xf32> to vector<8x4x8xf32>
    %c0_62 = arith.constant 0 : index
    %c0_63 = arith.constant 0 : index
    %c0_64 = arith.constant 0 : index
    %292 = vector.load %arg9[%c0_62, %c0_63, %c0_64] : memref<8x4x8xf32, #tpu.memory_space<vmem>>, vector<8x4x8xf32>
    tpu.vector_store %arg9[%c0_62, %c0_63, %c0_64], %291 {strides = array<i32>} : memref<8x4x8xf32, #tpu.memory_space<vmem>>, vector<8x4x8xf32>,
    return
  }
}

</mosaic_0001>

<bundles_post_ra>
// kernel: ddrqn_forward.1
= control target key start
LH: loop header
LB: loop body
LE: loop exit
PB: predicated region body
PF: predicated region fallthrough
CT: control target
= control target key end

     0   :  { %16 = vsyncpa [#allocation3], 0  ;;  %s2320_s0 = inlined_call_operand.vmem [shape: f32[8,4,16], index: 0, kind: input, shape index: {}]   ;;  %s2321_s1 = inlined_call_operand.hbm [shape: f32[16,32], index: 1, kind: input, shape index: {}]   ;;  %s2322_s2 = inlined_call_operand.vmem [shape: f32[32,32], index: 2, kind: input, shape index: {}]   ;;  %s2323_s3 = inlined_call_operand.vmem [shape: f32[32,96], index: 3, kind: input, shape index: {}]   ;;  %s2324_s4 = inlined_call_operand.vmem [shape: f32[32,96], index: 4, kind: input, shape index: {}]   ;;  %s2325_s5 = inlined_call_operand.vmem [shape: f32[32,32], index: 5, kind: input, shape index: {}]   ;;  %s2326_s6 = inlined_call_operand.vmem [shape: f32[32,8], index: 6, kind: input, shape index: {}]   ;;  %s2327_s7 = inlined_call_operand.vmem [shape: f32[8,128], index: 7, kind: input, shape index: {}]   ;;  %s2328_s8 = inlined_call_operand.vmem [shape: f32[4,32], index: 8, kind: input, shape index: {}]   ;;  %s2329_s9 = inlined_call_operand.vmem [shape: f32[8,4,8], index: 9, kind: output, shape index: {0}]   ;;  %s2330_s10 = inlined_call_operand.hbm [shape: f32[4,32], index: 10, kind: output, shape index: {1}]  }
   0x1   :  { %17 = vsyncpa [#allocation4], 0  ;;  %s1915_s13 = smov [#allocation2]  }
   0x2   :  { %s25_s14 = sshll.u32 %s1915_s13, 4  ;;  %s26_s14 = int_to_ptr.vmem [resolvable:$true] %s25_s14 }
   0x3   :  { %s1879_s15 = scalar_lea.vmem %s26_s14, 256  ;;  %p1884_p1 = scmp.lt.s32.totalorder %s26_s14, %s26_s14 }
   0x4   :  { %p1880_p0 = scmp.ne.s32.totalorder %s26_s14, %s1879_s15  ;;  %p1885_p2 = scmp.lt.s32.totalorder %s1879_s15, %s1879_s15 }
   0x6   :  { %p1886_p3 = por %p1885_p2, %p1884_p1 }
   0x8   :  { %p1887_p4 = pnand %p1886_p3, %p1880_p0 }
   0xa   :  { %1890 = shalt.err (!%p1887_p4)
}
   0xb   :  { %s1916_s16 = smov 128   ;;  %s1917_s17 = smov 8  }
   0xc   :  { %31 = dma.hbm_to_vmem [thread:$0]  %s2321_s1, 256, %s26_s14, [#allocation3], %s1916_s16, %s1916_s16, %s1917_s17  }
   0xd   :  { %1911 = dma.done.wait [#allocation3], 256  }
   0xe   :  { %1912 = vsyncadd [#allocation3], 4294967040  ;;  %v59_v0 = vld [vmem:[#allocation2 + $0x8] sm:$0xff]  ;;  %v58_v1 = vld [vmem:[#allocation2] sm:$0xff]  ;;  %vm76_vm0 = vcmask 130048   ;;  %v1918_v10 = vmov 0.0   ;;  %v60_v11 = vlaneseq }
   0xf   :  { %1656 = vmatprep.subr.mxu0 %v59_v0  ;;  %v1819_v2 = vld [vmem:[%s2320_s0] sm:$0xff]   ;;  %v1820_v3 = vld [vmem:[%s2320_s0 + $0x8] sm:$0xff]   ;;  %v1821_v4 = vld [vmem:[%s2320_s0 + $0x10] sm:$0xff]   ;;  %vm190_vm1 = vcmask 261120   ;;  %vm1919_vm6 = vmmov 0   ;;  %s1920_s27 = smov 64  }
  0x10   :  { %1657 = vmatpush3.msra.mxu0 %v59_v0  ;;  %1660 = vmatprep.mubr.msk.f32.mxu0 %vm76_vm0, %v1819_v2  ;;  %v1822_v5 = vld [vmem:[%s2320_s0 + $0x18] sm:$0xff]   ;;  %v184_v7 = vld [vmem:[%s2322_s2 + $0x10] sm:$0xff]  ;;  %v183_v8 = vld [vmem:[%s2322_s2 + $0x8] sm:$0xff]  ;;  %v2007_v12 = vshrl.u32 %v60_v11, 7  ;;  %s1922_s30 = smov 96   ;;  %vm1269_vm11 = vcmask 261124  }
  0x11   :  { %1658 = vmatprep.subr.mxu0 %v58_v1  ;;  %v185_v6 = vld [vmem:[%s2322_s2 + $0x18] sm:$0xff]  ;;  %v182_v9 = vld [vmem:[%s2322_s2] sm:$0xff]  ;;  %v2026_v31 = vld [vmem:[%s2324_s4 + $0x10] sm:$0xff] }
  0x12   :  { %1659 = vmatpush3.msra.mxu0 %v58_v1  ;;  %1666 = vmatprep.subr.mxu1 %v185_v6  ;;  %v62_v13 = vsub.s32 0, %v2007_v12  ;;  %v2013_v14 = vld [vmem:[%s2327_s7] sm:$0xff]  ;;  %v2019_v28 = vld [vmem:[%s2324_s4 + $0x18] sm:$0xff]  ;;  %v2033_v34 = vld [vmem:[%s2324_s4 + $0x8] sm:$0xff]  ;;  %v411_v38 = vsub.s32 3, %v2007_v12  ;;  %v188_v43 = vsub.s32 1, %v2007_v12 }
  0x13   :  { %1661 = vmatmul.mubr.msk.f32.vlgmr.msra.gmra.mxu0 %vm76_vm0, %v1820_v3  ;;  %1667 = vmatpush3.msra.mxu1 %v185_v6  ;;  %v2042_v35 = vld [vmem:[%s2324_s4] sm:$0xff]  ;;  %v303_v37 = vld [vmem:[%s2323_s3 + $0x18] sm:$0xff]  ;;  %v302_v39 = vld [vmem:[%s2323_s3 + $0x10] sm:$0xff]  ;;  %v306_v1 = vsub.s32 2, %v2007_v12 }
  0x14   :  { %1663 = vmatprep.mubr.msk.f32.mxu0 %vm76_vm0, %v1821_v4  ;;  %1668 = vmatprep.subr.mxu1 %v184_v7  ;;  %v63_v15 = vrot.slane %v2013_v14, %v62_v13  ;;  %v2050_v36 = vld [vmem:[%s2328_s8] sm:$0xf]  ;;  %v412_v40 = vrot.slane %v2013_v14, %v411_v38  ;;  %v301_v41 = vld [vmem:[%s2323_s3 + $0x8] sm:$0xff]  ;;  %v189_v44 = vrot.slane %v2013_v14, %v188_v43 }
  0x15   :  { %1669 = vmatpush3.msra.mxu1 %v184_v7  ;;  %1680 = vmatprep.subr.mxu0 %v303_v37  ;;  %v300_v42 = vld [vmem:[%s2323_s3] sm:$0xff]  ;;  %s1921_s3 = smov 32   ;;  %v2106_v2 = vrot.slane %v2013_v14, %v306_v1 }
  0x16   :  { %1670 = vmatprep.subr.mxu1 %v183_v8  ;;  %1681 = vmatpush3.msra.mxu0 %v303_v37 }
  0x17   :  { %1664 = vmatmul.mubr.msk.f32.gmra.mxu0 %vm76_vm0, %v1822_v5  ;;  %1671 = vmatpush3.msra.mxu1 %v183_v8 }
  0x18   :  { %1672 = vmatprep.subr.mxu1 %v182_v9  ;;  %1682 = vmatprep.subr.mxu0 %v302_v39 }
  0x19   :  { %1673 = vmatpush3.msra.mxu1 %v182_v9  ;;  %1683 = vmatpush3.msra.mxu0 %v302_v39 }
  0x1a   :  { %1694 = vmatprep.subr.mxu1 %v1918_v10  ;;  %495 = vrot.lane.b32.xlu0 %v412_v40, %s1920_s27 }
  0x1b   :  { %1684 = vmatprep.subr.mxu0 %v301_v41 }
  0x1c   :  { %1685 = vmatpush3.msra.mxu0 %v301_v41 }
  0x1d   :  { %1686 = vmatprep.subr.mxu0 %v300_v42 }
  0x1e   :  { %1687 = vmatpush3.msra.mxu0 %v300_v42 }
  0x1f   :  { %1705 = vmatprep.subr.mxu0 %v1918_v10 }
  0x8c   :  { %v2085_v54 = vpop.permute.xlu0 %495 }
  0xd3   :  { %v1662_v16 = vpop.f32.mrf.mxu0 }
  0xd4   :  { %v157_v17 = vadd.f32 %v1662_v16, %v63_v15 }
  0xd5   :  { %v151_v18 = vpop.f32.mrf.mxu0 }
  0xd6   :  { %v152_v19 = vadd.f32 %v151_v18, %v63_v15  ;;  %v175_v20 = vmul.f32 0.01, %v157_v17  ;;  %vm171_vm2 = vcmp.gt.f32.partialorder %v157_v17, 0.0 }
  0xd7   :  { %v1665_v21 = vpop.f32.mrf.mxu0 }
  0xd8   :  { %vm170_vm3 = vcmp.gt.f32.partialorder %v152_v19, 0.0  ;;  %v174_v22 = vmul.f32 0.01, %v152_v19  ;;  %v167_v23 = vadd.f32 %v1665_v21, %v63_v15  ;;  %v179_v29 = vsel %vm171_vm2, %v157_v17, %v175_v20 }
  0xd9   :  { %v161_v24 = vpop.f32.mrf.mxu0 }
  0xda   :  { %v178_v25 = vsel %vm170_vm3, %v152_v19, %v174_v22  ;;  %vm173_vm4 = vcmp.gt.f32.partialorder %v167_v23, 0.0  ;;  %v177_v26 = vmul.f32 0.01, %v167_v23  ;;  %v162_v27 = vadd.f32 %v161_v24, %v63_v15 }
  0xdb   :  { %1674 = vmatprep.mubr.msk.f32.mxu1 %vm190_vm1, %v178_v25 }
  0xdc   :  { %1675 = vmatmul.mubr.msk.f32.vlgmr.msra.gmra.mxu1 %vm190_vm1, %v179_v29  ;;  %vm172_vm5 = vcmp.gt.f32.partialorder %v162_v27, 0.0  ;;  %v176_v30 = vmul.f32 0.01, %v162_v27  ;;  %v181_v32 = vsel %vm173_vm4, %v167_v23, %v177_v26 }
  0xdd   :  { %1695 = vmatpush3.msra.mxu1 %v2019_v28 }
  0xde   :  { %v180_v33 = vsel %vm172_vm5, %v162_v27, %v176_v30  ;;  %1696 = vmatprep.subr.mxu1 %v1918_v10 }
  0xdf   :  { %1677 = vmatprep.mubr.msk.f32.mxu1 %vm190_vm1, %v180_v33  ;;  %1697 = vmatpush3.msra.mxu1 %v2026_v31 }
  0xe0   :  { %1678 = vmatmul.mubr.msk.f32.gmra.mxu1 %vm190_vm1, %v181_v32  ;;  %1698 = vmatprep.subr.mxu1 %v1918_v10 }
  0xe1   :  { %1699 = vmatpush3.msra.mxu1 %v2033_v34  ;;  %1702 = vmatprep.mubr.msk.f32.mxu1 %vm1919_vm6, %v1918_v10 }
  0xe2   :  { %1700 = vmatprep.subr.mxu1 %v1918_v10 }
  0xe3   :  { %1701 = vmatpush3.msra.mxu1 %v2042_v35 }
  0xe4   :  { %1703 = vmatmul.mubr.msk.f32.vlgmr.msra.gmra.mxu1 %vm190_vm1, %v2050_v36  ;;  %1716 = vmatprep.subr.mxu1 %v1918_v10 }
  0xe5   :  { %1717 = vmatpush3.msra.mxu1 %v2019_v28  ;;  %1724 = vmatprep.mubr.msk.f32.mxu1 %vm1919_vm6, %v1918_v10 }
  0xe6   :  { %1718 = vmatprep.subr.mxu1 %v1918_v10 }
  0xe7   :  { %1719 = vmatpush3.msra.mxu1 %v2026_v31 }
  0xe8   :  { %1720 = vmatprep.subr.mxu1 %v1918_v10 }
  0xe9   :  { %1721 = vmatpush3.msra.mxu1 %v2033_v34 }
  0xea   :  { %1722 = vmatprep.subr.mxu1 %v1918_v10 }
  0xeb   :  { %1723 = vmatpush3.msra.mxu1 %v2042_v35 }
  0xec   :  { %1738 = vmatprep.subr.mxu1 %v1918_v10 }
 0x19c   :  { %v1676_v45 = vpop.f32.mrf.mxu1 }
 0x19d   :  { %v275_v46 = vadd.f32 %v1676_v45, %v189_v44 }
 0x19e   :  { %v269_v47 = vpop.f32.mrf.mxu1 }
 0x19f   :  { %v270_v48 = vadd.f32 %v269_v47, %v189_v44  ;;  %v293_v49 = vmul.f32 0.01, %v275_v46  ;;  %vm289_vm7 = vcmp.gt.f32.partialorder %v275_v46, 0.0 }
 0x1a0   :  { %v1679_v50 = vpop.f32.mrf.mxu1 }
 0x1a1   :  { %vm288_vm8 = vcmp.gt.f32.partialorder %v270_v48, 0.0  ;;  %v292_v51 = vmul.f32 0.01, %v270_v48  ;;  %v285_v52 = vadd.f32 %v1679_v50, %v189_v44  ;;  %v297_v58 = vsel %vm289_vm7, %v275_v46, %v293_v49 }
 0x1a2   :  { %v279_v53 = vpop.f32.mrf.mxu1 }
 0x1a3   :  { %v296_v55 = vsel %vm288_vm8, %v270_v48, %v292_v51  ;;  %vm291_vm9 = vcmp.gt.f32.partialorder %v285_v52, 0.0  ;;  %v295_v56 = vmul.f32 0.01, %v285_v52  ;;  %v280_v57 = vadd.f32 %v279_v53, %v189_v44 }
 0x1a4   :  { %1688 = vmatprep.mubr.msk.f32.mxu0 %vm190_vm1, %v296_v55  ;;  %v483_v59 = vpop.f32.mrf.mxu1 }
 0x1a5   :  { %1689 = vmatmul.mubr.msk.f32.vlgmr.msra.gmra.mxu0 %vm190_vm1, %v297_v58  ;;  %vm290_vm10 = vcmp.gt.f32.partialorder %v280_v57, 0.0  ;;  %v294_v60 = vmul.f32 0.01, %v280_v57  ;;  %v498_v61 = vadd.f32 %v2085_v54, %v483_v59  ;;  %v299_v62 = vsel %vm291_vm9, %v285_v52, %v295_v56 }
 0x1a6   :  { %v1704_v63 = vpop.f32.mrf.mxu1  ;;  %1706 = vmatpush3.msra.mxu0 %v2019_v28 }
 0x1a7   :  { %v298_v0 = vsel %vm290_vm10, %v280_v57, %v294_v60  ;;  %500 = vrot.lane.b32.xlu0 %v498_v61, %s1920_s27  ;;  %1707 = vmatprep.subr.mxu0 %v1918_v10 }
 0x1a8   :  { %1691 = vmatprep.mubr.msk.f32.mxu0 %vm190_vm1, %v298_v0  ;;  %1708 = vmatpush3.msra.mxu0 %v2026_v31 }
 0x1a9   :  { %1692 = vmatmul.mubr.msk.f32.gmra.mxu0 %vm190_vm1, %v299_v62  ;;  %1709 = vmatprep.subr.mxu0 %v1918_v10 }
 0x1aa   :  { %1710 = vmatpush3.msra.mxu0 %v2033_v34  ;;  %1713 = vmatprep.mubr.msk.f32.mxu0 %vm1919_vm6, %v1918_v10 }
 0x1ab   :  { %516 = vrot.lane.b32.xlu0 %v2050_v36, %s1921_s3  ;;  %1711 = vmatprep.subr.mxu0 %v1918_v10 }
 0x1ac   :  { %1712 = vmatpush3.msra.mxu0 %v2042_v35 }
 0x1ad   :  { %1727 = vmatprep.subr.mxu0 %v1918_v10 }
 0x219   :  { %v501_v17 = vpop.permute.xlu0 %500 }
 0x21d   :  { %v517_v22 = vpop.permute.xlu0 %516 }
 0x265   :  { %v1690_v3 = vpop.f32.mrf.mxu0 }
 0x266   :  { %v2109_v4 = vadd.f32 %v1690_v3, %v2106_v2 }
 0x267   :  { %v386_v5 = vpop.f32.mrf.mxu0 }
 0x268   :  { %v387_v6 = vadd.f32 %v386_v5, %v2106_v2 }
 0x269   :  { %v1693_v7 = vpop.f32.mrf.mxu0 }
 0x26a   :  { %v487_v8 = vadd.f32 %v483_v59, %v387_v6  ;;  %v2113_v9 = vadd.f32 %v1693_v7, %v2106_v2 }
 0x26b   :  { %v2132_v30 = vpop.f32.mrf.mxu0 }
 0x26c   :  { %v1555_v11 = vmul.f32 -1.442695, %v487_v8 }
 0x26e   :  { %1823 = vpow2.f32 %v1555_v11 }
 0x27b   :  { %v1824_v13 = vpop.eup %1823 }
 0x27c   :  { %v491_v15 = vadd.f32 1.0, %v1824_v13 }
 0x27e   :  { %1825 = vrcp.f32 %v491_v15 }
 0x28b   :  { %v1826_v16 = vpop.eup %1825 }
 0x28c   :  { %v503_v18 = vmul.f32 %v1826_v16, %v501_v17  ;;  %v510_v23 = vsub.f32 1.0, %v1826_v16  ;;  %v519_v25 = vmul.f32 %v1826_v16, %v517_v22 }
 0x28e   :  { %505 = vrot.lane.b32.xlu1 %v503_v18, %s1920_s27 }
 0x300   :  { %v506_v19 = vpop.permute.xlu1 %505 }
 0x301   :  { %v508_v20 = vadd.f32 %v506_v19, %v387_v6 }
 0x303   :  { %1827 = vtanh.f32 %v508_v20 }
 0x310   :  { %v1828_v21 = vpop.eup %1827 }
 0x311   :  { %512 = vrot.lane.b32.xlu1 %v1828_v21, %s1922_s30 }
 0x383   :  { %v513_v24 = vpop.permute.xlu1 %512 }
 0x384   :  { %v515_v26 = vmul.f32 %v513_v24, %v510_v23 }
 0x386   :  { %v2117_v27 = vadd.f32 %v519_v25, %v515_v26 }
 0x388   :  { %522 = vrot.lane.b32.xlu1 %v2117_v27, %s1922_s30  ;;  %v625_v50 = vrot.slane %v2117_v27, 4 }
 0x3fa   :  { %v523_v29 = vpop.permute.xlu1 %522 }
 0x3fb   :  { %1714 = vmatmul.mubr.msk.f32.vlgmr.msra.gmra.mxu0 %vm190_vm1, %v523_v29 }
 0x3fc   :  { %1728 = vmatpush3.msra.mxu0 %v2019_v28  ;;  %1735 = vmatprep.mubr.msk.f32.mxu0 %vm1919_vm6, %v1918_v10 }
 0x3fd   :  { %1729 = vmatprep.subr.mxu0 %v1918_v10 }
 0x3fe   :  { %1730 = vmatpush3.msra.mxu0 %v2026_v31 }
 0x3ff   :  { %1731 = vmatprep.subr.mxu0 %v1918_v10 }
 0x400   :  { %1732 = vmatpush3.msra.mxu0 %v2033_v34 }
 0x401   :  { %1733 = vmatprep.subr.mxu0 %v1918_v10 }
 0x402   :  { %1734 = vmatpush3.msra.mxu0 %v2042_v35 }
 0x403   :  { %1749 = vmatprep.subr.mxu0 %v1918_v10 }
 0x4bb   :  { %v592_v32 = vpop.f32.mrf.mxu0 }
 0x4bc   :  { %v606_v33 = vadd.f32 %v592_v32, %v2085_v54  ;;  %v597_v38 = vrot.slane %v592_v32, 4 }
 0x4bd   :  { %v1715_v36 = vpop.f32.mrf.mxu0 }
 0x4be   :  { %v608_v37 = vrot.slane %v606_v33, 4  ;;  %v599_v39 = vadd.f32 %v597_v38, %v387_v6 }
 0x4c0   :  { %609 = vrot.lane.b32.xlu0 %v608_v37, %s1920_s27  ;;  %v1557_v40 = vmul.f32 -1.442695, %v599_v39 }
 0x4c2   :  { %1829 = vpow2.f32 %v1557_v40 }
 0x4cf   :  { %v1830_v41 = vpop.eup %1829 }
 0x4d0   :  { %v603_v42 = vadd.f32 1.0, %v1830_v41 }
 0x4d2   :  { %1831 = vrcp.f32 %v603_v42 }
 0x4df   :  { %v1832_v43 = vpop.eup %1831 }
 0x4e0   :  { %v619_v49 = vsub.f32 1.0, %v1832_v43  ;;  %v627_v53 = vmul.f32 %v1832_v43, %v625_v50  ;;  %v397_v50 = vadd.f32 %v2132_v30, %v2106_v2 }
 0x532   :  { %v610_v44 = vpop.permute.xlu0 %609 }
 0x533   :  { %v612_v45 = vmul.f32 %v1832_v43, %v610_v44 }
 0x535   :  { %614 = vrot.lane.b32.xlu1 %v612_v45, %s1920_s27 }
 0x5a7   :  { %v615_v46 = vpop.permute.xlu1 %614 }
 0x5a8   :  { %v617_v47 = vadd.f32 %v615_v46, %v387_v6 }
 0x5aa   :  { %1833 = vtanh.f32 %v617_v47 }
 0x5b7   :  { %v1834_v48 = vpop.eup %1833 }
 0x5b8   :  { %621 = vrot.lane.b32.xlu0 %v1834_v48, %s1922_s30 }
 0x62a   :  { %v622_v51 = vpop.permute.xlu0 %621 }
 0x62b   :  { %v624_v52 = vmul.f32 %v622_v51, %v619_v49 }
 0x62d   :  { %v628_v55 = vadd.f32 %v627_v53, %v624_v52 }
 0x62f   :  { %v2139_v56 = vrot.slane %v628_v55, 4 }
 0x631   :  { %631 = vrot.lane.b32.xlu1 %v2139_v56, %s1922_s30 }
 0x6a3   :  { %v632_v57 = vpop.permute.xlu1 %631 }
 0x6a4   :  { %1725 = vmatmul.mubr.msk.f32.vlgmr.msra.gmra.mxu1 %vm190_vm1, %v632_v57 }
 0x6a5   :  { %1739 = vmatpush3.msra.mxu1 %v2019_v28  ;;  %1746 = vmatprep.mubr.msk.f32.mxu1 %vm1919_vm6, %v1918_v10 }
 0x6a6   :  { %1740 = vmatprep.subr.mxu1 %v1918_v10 }
 0x6a7   :  { %1741 = vmatpush3.msra.mxu1 %v2026_v31 }
 0x6a8   :  { %1742 = vmatprep.subr.mxu1 %v1918_v10 }
 0x6a9   :  { %1743 = vmatpush3.msra.mxu1 %v2033_v34 }
 0x6aa   :  { %1744 = vmatprep.subr.mxu1 %v1918_v10 }
 0x6ab   :  { %1745 = vmatpush3.msra.mxu1 %v2042_v35 }
 0x6ac   :  { %1760 = vmatprep.subr.mxu1 %v1918_v10 }
 0x764   :  { %v701_v58 = vpop.f32.mrf.mxu1 }
 0x765   :  { %v712_v59 = vadd.f32 %v701_v58, %v2085_v54  ;;  %v705_v61 = vadd.f32 %v701_v58, %v2109_v4 }
 0x766   :  { %v1726_v60 = vpop.f32.mrf.mxu1 }
 0x767   :  { %714 = vrot.lane.b32.xlu0 %v712_v59, %s1920_s27  ;;  %v1559_v62 = vmul.f32 -1.442695, %v705_v61 }
 0x769   :  { %1835 = vpow2.f32 %v1559_v62 }
 0x776   :  { %v1836_v63 = vpop.eup %1835 }
 0x777   :  { %v709_v0 = vadd.f32 1.0, %v1836_v63 }
 0x779   :  { %1837 = vrcp.f32 %v709_v0 }
 0x786   :  { %v1838_v1 = vpop.eup %1837 }
 0x787   :  { %v724_v11 = vsub.f32 1.0, %v1838_v1  ;;  %v731_v15 = vmul.f32 %v1838_v1, %v2139_v56 }
 0x7d9   :  { %v715_v3 = vpop.permute.xlu0 %714 }
 0x7da   :  { %v717_v5 = vmul.f32 %v1838_v1, %v715_v3 }
 0x7dc   :  { %719 = vrot.lane.b32.xlu1 %v717_v5, %s1920_s27 }
 0x84e   :  { %v720_v6 = vpop.permute.xlu1 %719 }
 0x84f   :  { %v722_v7 = vadd.f32 %v720_v6, %v2109_v4 }
 0x851   :  { %1839 = vtanh.f32 %v722_v7 }
 0x85e   :  { %v1840_v8 = vpop.eup %1839 }
 0x85f   :  { %726 = vrot.lane.b32.xlu0 %v1840_v8, %s1922_s30 }
 0x8d1   :  { %v727_v13 = vpop.permute.xlu0 %726 }
 0x8d2   :  { %v729_v16 = vmul.f32 %v727_v13, %v724_v11 }
 0x8d4   :  { %v2161_v17 = vadd.f32 %v731_v15, %v729_v16 }
 0x8d6   :  { %734 = vrot.lane.b32.xlu1 %v2161_v17, %s1922_s30  ;;  %v837_v41 = vrot.slane %v2161_v17, 4 }
 0x948   :  { %v735_v18 = vpop.permute.xlu1 %734 }
 0x949   :  { %1736 = vmatmul.mubr.msk.f32.vlgmr.msra.gmra.mxu0 %vm190_vm1, %v735_v18 }
 0x94a   :  { %1750 = vmatpush3.msra.mxu0 %v2019_v28  ;;  %1757 = vmatprep.mubr.msk.f32.mxu0 %vm1919_vm6, %v1918_v10 }
 0x94b   :  { %1751 = vmatprep.subr.mxu0 %v1918_v10 }
 0x94c   :  { %1752 = vmatpush3.msra.mxu0 %v2026_v31 }
 0x94d   :  { %1753 = vmatprep.subr.mxu0 %v1918_v10 }
 0x94e   :  { %1754 = vmatpush3.msra.mxu0 %v2033_v34 }
 0x94f   :  { %1755 = vmatprep.subr.mxu0 %v1918_v10 }
 0x950   :  { %1756 = vmatpush3.msra.mxu0 %v2042_v35 }
 0x951   :  { %1771 = vmatprep.subr.mxu0 %v1918_v10 }
 0xa09   :  { %v804_v19 = vpop.f32.mrf.mxu0 }
 0xa0a   :  { %v818_v20 = vadd.f32 %v804_v19, %v2085_v54  ;;  %v809_v23 = vrot.slane %v804_v19, 4 }
 0xa0b   :  { %v1737_v21 = vpop.f32.mrf.mxu0 }
 0xa0c   :  { %v820_v22 = vrot.slane %v818_v20, 4  ;;  %v811_v24 = vadd.f32 %v809_v23, %v2109_v4 }
 0xa0e   :  { %821 = vrot.lane.b32.xlu0 %v820_v22, %s1920_s27  ;;  %v1561_v25 = vmul.f32 -1.442695, %v811_v24 }
 0xa10   :  { %1841 = vpow2.f32 %v1561_v25 }
 0xa1d   :  { %v1842_v26 = vpop.eup %1841 }
 0xa1e   :  { %v815_v29 = vadd.f32 1.0, %v1842_v26 }
 0xa20   :  { %1843 = vrcp.f32 %v815_v29 }
 0xa2d   :  { %v1844_v32 = vpop.eup %1843 }
 0xa2e   :  { %v831_v40 = vsub.f32 1.0, %v1844_v32  ;;  %v839_v44 = vmul.f32 %v1844_v32, %v837_v41 }
 0xa80   :  { %v822_v33 = vpop.permute.xlu0 %821 }
 0xa81   :  { %v824_v36 = vmul.f32 %v1844_v32, %v822_v33 }
 0xa83   :  { %826 = vrot.lane.b32.xlu1 %v824_v36, %s1920_s27 }
 0xaf5   :  { %v827_v37 = vpop.permute.xlu1 %826 }
 0xaf6   :  { %v829_v38 = vadd.f32 %v827_v37, %v2109_v4 }
 0xaf8   :  { %1845 = vtanh.f32 %v829_v38 }
 0xb05   :  { %v1846_v39 = vpop.eup %1845 }
 0xb06   :  { %833 = vrot.lane.b32.xlu0 %v1846_v39, %s1922_s30 }
 0xb78   :  { %v834_v42 = vpop.permute.xlu0 %833 }
 0xb79   :  { %v836_v43 = vmul.f32 %v834_v42, %v831_v40 }
 0xb7b   :  { %v840_v45 = vadd.f32 %v839_v44, %v836_v43 }
 0xb7d   :  { %v2183_v46 = vrot.slane %v840_v45, 4 }
 0xb7f   :  { %843 = vrot.lane.b32.xlu1 %v2183_v46, %s1922_s30 }
 0xbf1   :  { %v844_v47 = vpop.permute.xlu1 %843 }
 0xbf2   :  { %1747 = vmatmul.mubr.msk.f32.vlgmr.msra.gmra.mxu1 %vm190_vm1, %v844_v47 }
 0xbf3   :  { %1761 = vmatpush3.msra.mxu1 %v2019_v28  ;;  %1768 = vmatprep.mubr.msk.f32.mxu1 %vm1919_vm6, %v1918_v10 }
 0xbf4   :  { %1762 = vmatprep.subr.mxu1 %v1918_v10 }
 0xbf5   :  { %1763 = vmatpush3.msra.mxu1 %v2026_v31 }
 0xbf6   :  { %1764 = vmatprep.subr.mxu1 %v1918_v10 }
 0xbf7   :  { %1765 = vmatpush3.msra.mxu1 %v2033_v34 }
 0xbf8   :  { %1766 = vmatprep.subr.mxu1 %v1918_v10 }
 0xbf9   :  { %1767 = vmatpush3.msra.mxu1 %v2042_v35 }
 0xcb2   :  { %v913_v4 = vpop.f32.mrf.mxu1 }
 0xcb3   :  { %v924_v48 = vadd.f32 %v913_v4, %v2085_v54  ;;  %v917_v51 = vadd.f32 %v913_v4, %v397_v50 }
 0xcb4   :  { %v1748_v49 = vpop.f32.mrf.mxu1 }
 0xcb5   :  { %926 = vrot.lane.b32.xlu0 %v924_v48, %s1920_s27  ;;  %v1563_v52 = vmul.f32 -1.442695, %v917_v51 }
 0xcb7   :  { %1847 = vpow2.f32 %v1563_v52 }
 0xcc4   :  { %v1848_v53 = vpop.eup %1847 }
 0xcc5   :  { %v921_v55 = vadd.f32 1.0, %v1848_v53 }
 0xcc7   :  { %1849 = vrcp.f32 %v921_v55 }
 0xcd4   :  { %v1850_v57 = vpop.eup %1849 }
 0xcd5   :  { %v936_v63 = vsub.f32 1.0, %v1850_v57  ;;  %v943_v2 = vmul.f32 %v1850_v57, %v2183_v46 }
 0xd27   :  { %v927_v58 = vpop.permute.xlu0 %926 }
 0xd28   :  { %v929_v59 = vmul.f32 %v1850_v57, %v927_v58 }
 0xd2a   :  { %931 = vrot.lane.b32.xlu1 %v929_v59, %s1920_s27 }
 0xd9c   :  { %v932_v60 = vpop.permute.xlu1 %931 }
 0xd9d   :  { %v934_v61 = vadd.f32 %v932_v60, %v397_v50 }
 0xd9f   :  { %1851 = vtanh.f32 %v934_v61 }
 0xdac   :  { %v1852_v62 = vpop.eup %1851 }
 0xdad   :  { %938 = vrot.lane.b32.xlu0 %v1852_v62, %s1922_s30 }
 0xe1f   :  { %v939_v0 = vpop.permute.xlu0 %938 }
 0xe20   :  { %v941_v30 = vmul.f32 %v939_v0, %v936_v63 }
 0xe22   :  { %v2204_v1 = vadd.f32 %v943_v2, %v941_v30 }
 0xe24   :  { %946 = vrot.lane.b32.xlu1 %v2204_v1, %s1922_s30  ;;  %v1049_v21 = vrot.slane %v2204_v1, 4 }
 0xe96   :  { %v947_v3 = vpop.permute.xlu1 %946 }
 0xe97   :  { %1758 = vmatmul.mubr.msk.f32.vlgmr.msra.gmra.mxu0 %vm190_vm1, %v947_v3 }
 0xe98   :  { %1772 = vmatpush3.msra.mxu0 %v2019_v28  ;;  %1779 = vmatprep.mubr.msk.f32.mxu0 %vm1919_vm6, %v1918_v10 }
 0xe99   :  { %1773 = vmatprep.subr.mxu0 %v1918_v10 }
 0xe9a   :  { %1774 = vmatpush3.msra.mxu0 %v2026_v31 }
 0xe9b   :  { %1775 = vmatprep.subr.mxu0 %v1918_v10 }
 0xe9c   :  { %1776 = vmatpush3.msra.mxu0 %v2033_v34 }
 0xe9d   :  { %1777 = vmatprep.subr.mxu0 %v1918_v10 }
 0xe9e   :  { %1778 = vmatpush3.msra.mxu0 %v2042_v35 }
 0xf57   :  { %v1016_v5 = vpop.f32.mrf.mxu0 }
 0xf58   :  { %v1030_v6 = vadd.f32 %v1016_v5, %v2085_v54  ;;  %v1021_v8 = vrot.slane %v1016_v5, 4  ;;  %v1275_v5 = vld [vmem:[%s2325_s5 + $0x18] sm:$0xff] }
 0xf59   :  { %v1759_v7 = vpop.f32.mrf.mxu0  ;;  %1782 = vmatprep.subr.mxu1 %v1275_v5 }
 0xf5a   :  { %v1032_v28 = vrot.slane %v1030_v6, 4  ;;  %v1023_v11 = vadd.f32 %v1021_v8, %v397_v50  ;;  %v1274_v6 = vld [vmem:[%s2325_s5 + $0x10] sm:$0xff] }
 0xf5c   :  { %1033 = vrot.lane.b32.xlu0 %v1032_v28, %s1920_s27  ;;  %v1565_v13 = vmul.f32 -1.442695, %v1023_v11  ;;  %v1272_v28 = vld [vmem:[%s2325_s5] sm:$0xff] }
 0xf5e   :  { %1853 = vpow2.f32 %v1565_v13 }
 0xf6b   :  { %v1854_v31 = vpop.eup %1853 }
 0xf6c   :  { %v1027_v15 = vadd.f32 1.0, %v1854_v31 }
 0xf6e   :  { %1855 = vrcp.f32 %v1027_v15 }
 0xf7b   :  { %v1856_v16 = vpop.eup %1855 }
 0xf7c   :  { %v1043_v20 = vsub.f32 1.0, %v1856_v16  ;;  %v1051_v24 = vmul.f32 %v1856_v16, %v1049_v21  ;;  %v1397_v21 = vld [vmem:[%s2326_s6] sm:$0xff] }
 0xfce   :  { %v1034_v34 = vpop.permute.xlu0 %1033 }
 0xfcf   :  { %v1036_v18 = vmul.f32 %v1856_v16, %v1034_v34 }
 0xfd1   :  { %1038 = vrot.lane.b32.xlu1 %v1036_v18, %s1920_s27 }
0x1043   :  { %v1039_v10 = vpop.permute.xlu1 %1038 }
0x1044   :  { %v1041_v35 = vadd.f32 %v1039_v10, %v397_v50 }
0x1046   :  { %1857 = vtanh.f32 %v1041_v35 }
0x1053   :  { %v1858_v19 = vpop.eup %1857 }
0x1054   :  { %1045 = vrot.lane.b32.xlu0 %v1858_v19, %s1922_s30 }
0x10c6   :  { %v1046_v22 = vpop.permute.xlu0 %1045 }
0x10c7   :  { %v1048_v23 = vmul.f32 %v1046_v22, %v1043_v20  ;;  %v1398_v20 = vld [vmem:[%s2326_s6 + $0x8] sm:$0xff] }
0x10c9   :  { %v1052_v25 = vadd.f32 %v1051_v24, %v1048_v23  ;;  %v1278_v24 = vsub.s32 4, %v2007_v12 }
0x10cb   :  { %v1054_v26 = vrot.slane %v1052_v25, 4  ;;  %v1279_v25 = vrot.slane %v2013_v14, %v1278_v24 }
0x10cd   :  { %1055 = vrot.lane.b32.xlu1 %v1054_v26, %s1922_s30  ;;  %v1282_v3 = vcombine.low %v2204_v1, %v1054_v26 }
0x113f   :  { %v1056_v29 = vpop.permute.xlu1 %1055 }
0x1140   :  { %1769 = vmatmul.mubr.msk.f32.vlgmr.msra.gmra.mxu1 %vm190_vm1, %v1056_v29 }
0x1141   :  { %1783 = vmatpush3.msra.mxu1 %v1275_v5 }
0x1142   :  { %1784 = vmatprep.subr.mxu1 %v1274_v6 }
0x1143   :  { %1785 = vmatpush3.msra.mxu1 %v1274_v6 }
0x1200   :  { %v1125_v32 = vpop.f32.mrf.mxu1 }
0x1201   :  { %v1136_v33 = vadd.f32 %v1125_v32, %v2085_v54  ;;  %v1129_v37 = vadd.f32 %v1125_v32, %v2113_v9 }
0x1202   :  { %v1770_v36 = vpop.f32.mrf.mxu1 }
0x1203   :  { %1138 = vrot.lane.b32.xlu0 %v1136_v33, %s1920_s27  ;;  %v1567_v38 = vmul.f32 -1.442695, %v1129_v37 }
0x1205   :  { %1859 = vpow2.f32 %v1567_v38 }
0x1212   :  { %v1860_v39 = vpop.eup %1859 }
0x1213   :  { %v1133_v40 = vadd.f32 1.0, %v1860_v39 }
0x1215   :  { %1861 = vrcp.f32 %v1133_v40 }
0x1222   :  { %v1862_v41 = vpop.eup %1861 }
0x1223   :  { %v1148_v4 = vsub.f32 1.0, %v1862_v41  ;;  %v1155_v49 = vmul.f32 %v1862_v41, %v1054_v26 }
0x1275   :  { %v1139_v42 = vpop.permute.xlu0 %1138 }
0x1276   :  { %v1141_v43 = vmul.f32 %v1862_v41, %v1139_v42 }
0x1278   :  { %1143 = vrot.lane.b32.xlu1 %v1141_v43, %s1920_s27 }
0x12ea   :  { %v1144_v44 = vpop.permute.xlu1 %1143 }
0x12eb   :  { %v1146_v45 = vadd.f32 %v1144_v44, %v2113_v9 }
0x12ed   :  { %1863 = vtanh.f32 %v1146_v45 }
0x12fa   :  { %v1864_v47 = vpop.eup %1863 }
0x12fb   :  { %1150 = vrot.lane.b32.xlu0 %v1864_v47, %s1922_s30 }
0x136d   :  { %v1151_v48 = vpop.permute.xlu0 %1150 }
0x136e   :  { %v1153_v50 = vmul.f32 %v1151_v48, %v1148_v4  ;;  %v1403_v48 = vsub.s32 5, %v2007_v12 }
0x1370   :  { %v1156_v51 = vadd.f32 %v1155_v49, %v1153_v50  ;;  %v1404_v49 = vrot.slane %v2013_v14, %v1403_v48 }
0x1372   :  { %1158 = vrot.lane.b32.xlu1 %v1156_v51, %s1922_s30  ;;  %v1261_v13 = vrot.slane %v1156_v51, 4 }
0x13e4   :  { %v1159_v52 = vpop.permute.xlu1 %1158 }
0x13e5   :  { %1780 = vmatmul.mubr.msk.f32.vlgmr.msra.gmra.mxu0 %vm190_vm1, %v1159_v52 }
0x14a5   :  { %v1228_v53 = vpop.f32.mrf.mxu0 }
0x14a6   :  { %v1242_v55 = vadd.f32 %v1228_v53, %v2085_v54  ;;  %v1233_v59 = vrot.slane %v1228_v53, 4  ;;  %v1280_v54 = vcombine.low %v2117_v27, %v2139_v56  ;;  %v1273_v56 = vld [vmem:[%s2325_s5 + $0x8] sm:$0xff] }
0x14a7   :  { %v1781_v57 = vpop.f32.mrf.mxu0  ;;  %1786 = vmatprep.subr.mxu1 %v1273_v56 }
0x14a8   :  { %v1244_v58 = vrot.slane %v1242_v55, 4  ;;  %v1235_v60 = vadd.f32 %v1233_v59, %v2113_v9  ;;  %1787 = vmatpush3.msra.mxu1 %v1273_v56 }
0x14a9   :  { %1788 = vmatprep.subr.mxu1 %v1272_v28 }
0x14aa   :  { %1245 = vrot.lane.b32.xlu0 %v1244_v58, %s1920_s27  ;;  %v1569_v61 = vmul.f32 -1.442695, %v1235_v60  ;;  %1789 = vmatpush3.msra.mxu1 %v1272_v28 }
0x14ac   :  { %1865 = vpow2.f32 %v1569_v61 }
0x14b9   :  { %v1866_v62 = vpop.eup %1865 }
0x14ba   :  { %v1239_v63 = vadd.f32 1.0, %v1866_v62 }
0x14bc   :  { %1867 = vrcp.f32 %v1239_v63 }
0x14c9   :  { %v1868_v0 = vpop.eup %1867 }
0x14ca   :  { %v1255_v11 = vsub.f32 1.0, %v1868_v0  ;;  %v1263_v16 = vmul.f32 %v1868_v0, %v1261_v13 }
0x151c   :  { %v1246_v2 = vpop.permute.xlu0 %1245 }
0x151d   :  { %v1248_v30 = vmul.f32 %v1868_v0, %v1246_v2 }
0x151f   :  { %1250 = vrot.lane.b32.xlu1 %v1248_v30, %s1920_s27 }
0x1523   :  { %1284 = vrot.lane.b32.xlu1 %v1280_v54, %s1922_s30 }
0x1527   :  { %1288 = vrot.lane.b32.xlu1 %v1282_v3, %s1922_s30 }
0x1591   :  { %v1251_v7 = vpop.permute.xlu1 %1250 }
0x1592   :  { %v1253_v27 = vadd.f32 %v1251_v7, %v2113_v9  ;;  %v1281_v9 = vcombine.low %v2161_v17, %v2183_v46  ;;  %v1400_v17 = vld [vmem:[%s2326_s6 + $0x18] sm:$0xff]  ;;  %v1399_v46 = vld [vmem:[%s2326_s6 + $0x10] sm:$0xff]  ;;  %s1923_s6 = smov [#allocation5]  }
0x1593   :  { %1796 = vmatprep.subr.mxu0 %v1400_v17  ;;  %s1531_s23 = sshll.u32 %s1923_s6, 4  ;;  %s1532_s23 = int_to_ptr.vmem [resolvable:$true] %s1531_s23 }
0x1594   :  { %1869 = vtanh.f32 %v1253_v27  ;;  %1797 = vmatpush3.msra.mxu0 %v1400_v17  ;;  %s1891_s4 = scalar_lea.vmem %s1532_s23, 64  ;;  %p1896_p6 = scmp.lt.s32.totalorder %s1532_s23, %s1532_s23 }
0x1595   :  { %v1285_v1 = vpop.permute.xlu1 %1284  ;;  %1798 = vmatprep.subr.mxu0 %v1399_v46  ;;  %p1892_p5 = scmp.ne.s32.totalorder %s1532_s23, %s1891_s4  ;;  %p1897_p7 = scmp.lt.s32.totalorder %s1891_s4, %s1891_s4 }
0x1596   :  { %1790 = vmatprep.mubr.msk.f32.mxu1 %vm190_vm1, %v1285_v1  ;;  %1799 = vmatpush3.msra.mxu0 %v1399_v46 }
0x1597   :  { %1800 = vmatprep.subr.mxu0 %v1398_v20  ;;  %p1898_p8 = por %p1897_p7, %p1896_p6 }
0x1598   :  { %1801 = vmatpush3.msra.mxu0 %v1398_v20 }
0x1599   :  { %v1289_v10 = vpop.permute.xlu1 %1288  ;;  %1802 = vmatprep.subr.mxu0 %v1397_v21  ;;  %p1899_p9 = pnand %p1898_p8, %p1892_p5 }
0x159a   :  { %1803 = vmatpush3.msra.mxu0 %v1397_v21 }
0x15a1   :  { %v1870_v8 = vpop.eup %1869 }
0x15a2   :  { %1257 = vrot.lane.b32.xlu0 %v1870_v8, %s1922_s30 }
0x15a6   :  { %1286 = vrot.lane.b32.xlu0 %v1281_v9, %s1922_s30 }
0x1614   :  { %v1258_v31 = vpop.permute.xlu0 %1257 }
0x1615   :  { %v1260_v15 = vmul.f32 %v1258_v31, %v1255_v11 }
0x1617   :  { %v1264_v34 = vadd.f32 %v1263_v16, %v1260_v15 }
0x1618   :  { %v1287_v18 = vpop.permute.xlu0 %1286 }
0x1619   :  { %v1271_v35 = vrot.slane %v1264_v34, 4  ;;  %1266 = vrot.lane.b32.xlu1 %v1264_v34, %s1922_s30  ;;  %1791 = vmatmul.mubr.msk.f32.vlgmr.msra.gmra.mxu1 %vm190_vm1, %v1287_v18 }
0x161a   :  { %1793 = vmatprep.mubr.msk.f32.mxu1 %vm190_vm1, %v1289_v10 }
0x161b   :  { %v1283_v19 = vcombine.low %v1156_v51, %v1271_v35 }
0x161d   :  { %1290 = vrot.lane.b32.xlu0 %v1283_v19, %s1922_s30 }
0x168b   :  { %v1267_v22 = vpop.permute.xlu1 %1266 }
0x168c   :  { %1270 = vst.msk [vmem:[#allocation5 - $0x4] sm:$0xf0] %vm1269_vm11, %v1267_v22 }
0x168f   :  { %v1291_v23 = vpop.permute.xlu0 %1290 }
0x1690   :  { %1794 = vmatmul.mubr.msk.f32.gmra.mxu1 %vm190_vm1, %v1291_v23 }
0x16d9   :  { %v1792_v26 = vpop.f32.mrf.mxu1 }
0x16da   :  { %v1372_v29 = vadd.f32 %v1792_v26, %v1279_v25 }
0x16db   :  { %v1366_v32 = vpop.f32.mrf.mxu1 }
0x16dc   :  { %v1367_v33 = vadd.f32 %v1366_v32, %v1279_v25  ;;  %v1390_v36 = vmul.f32 0.01, %v1372_v29  ;;  %vm1386_vm12 = vcmp.gt.f32.partialorder %v1372_v29, 0.0 }
0x16de   :  { %vm1385_vm13 = vcmp.gt.f32.partialorder %v1367_v33, 0.0  ;;  %v1389_v37 = vmul.f32 0.01, %v1367_v33  ;;  %v1394_v39 = vsel %vm1386_vm12, %v1372_v29, %v1390_v36 }
0x16e0   :  { %v1393_v38 = vsel %vm1385_vm13, %v1367_v33, %v1389_v37 }
0x16e1   :  { %1804 = vmatprep.mubr.msk.f32.mxu0 %vm190_vm1, %v1393_v38 }
0x16e2   :  { %1805 = vmatmul.mubr.msk.f32.vlgmr.msra.gmra.mxu0 %vm190_vm1, %v1394_v39 }
0x1750   :  { %v1795_v40 = vpop.f32.mrf.mxu1 }
0x1751   :  { %v1382_v41 = vadd.f32 %v1795_v40, %v1279_v25 }
0x1752   :  { %v1376_v42 = vpop.f32.mrf.mxu1 }
0x1753   :  { %v1377_v43 = vadd.f32 %v1376_v42, %v1279_v25  ;;  %v1392_v44 = vmul.f32 0.01, %v1382_v41  ;;  %vm1388_vm14 = vcmp.gt.f32.partialorder %v1382_v41, 0.0 }
0x1755   :  { %vm1387_vm15 = vcmp.gt.f32.partialorder %v1377_v43, 0.0  ;;  %v1391_v45 = vmul.f32 0.01, %v1377_v43  ;;  %v1396_v4 = vsel %vm1388_vm14, %v1382_v41, %v1392_v44 }
0x1757   :  { %v1395_v47 = vsel %vm1387_vm15, %v1377_v43, %v1391_v45 }
0x1758   :  { %1807 = vmatprep.mubr.msk.f32.mxu0 %vm190_vm1, %v1395_v47 }
0x1759   :  { %1808 = vmatmul.mubr.msk.f32.gmra.mxu0 %vm190_vm1, %v1396_v4 }
0x175a   :  { %1902 = shalt.err (!%p1899_p9)
}
0x175b   :  { %1534 = dma.vmem_to_hbm [thread:$0]  %s1532_s23, 64, %s2330_s10, [#allocation4]   ;;  %vm1514_vm0 = vcmask 60416  }
0x17a2   :  { %v1806_v50 = vpop.f32.mrf.mxu0 }
0x17a3   :  { %v1489_v51 = vadd.f32 %v1806_v50, %v1404_v49 }
0x17a4   :  { %v1483_v12 = vpop.f32.mrf.mxu0 }
0x17a5   :  { %v1507_v52 = vcombine.high %v1489_v51, %v1489_v51  ;;  %1517 = vst.msk [vmem:[%s2329_s9 + $0x8] sm:$0xf] %vm1514_vm0, %v1489_v51  ;;  %v1484_v14 = vadd.f32 %v1483_v12, %v1404_v49 }
0x17a7   :  { %1518 = vst.msk [vmem:[%s2329_s9 + $0xc] sm:$0xf] %vm1514_vm0, %v1507_v52  ;;  %v1506_v53 = vcombine.high %v1484_v14, %v1484_v14  ;;  %1515 = vst.msk [vmem:[%s2329_s9] sm:$0xf] %vm1514_vm0, %v1484_v14 }
0x17a9   :  { %1516 = vst.msk [vmem:[%s2329_s9 + $0x4] sm:$0xf] %vm1514_vm0, %v1506_v53 }
0x1819   :  { %v1809_v55 = vpop.f32.mrf.mxu0 }
0x181a   :  { %v1499_v57 = vadd.f32 %v1809_v55, %v1404_v49 }
0x181b   :  { %v1493_v58 = vpop.f32.mrf.mxu0 }
0x181c   :  { %v1509_v59 = vcombine.high %v1499_v57, %v1499_v57  ;;  %1521 = vst.msk [vmem:[%s2329_s9 + $0x18] sm:$0xf] %vm1514_vm0, %v1499_v57  ;;  %v1494_v60 = vadd.f32 %v1493_v58, %v1404_v49 }
0x181e   :  { %1522 = vst.msk [vmem:[%s2329_s9 + $0x1c] sm:$0xf] %vm1514_vm0, %v1509_v59  ;;  %v1508_v61 = vcombine.high %v1494_v60, %v1494_v60  ;;  %1519 = vst.msk [vmem:[%s2329_s9 + $0x10] sm:$0xf] %vm1514_vm0, %v1494_v60 }
0x1820   :  { %1520 = vst.msk [vmem:[%s2329_s9 + $0x14] sm:$0xf] %vm1514_vm0, %v1508_v61 }
0x1821   :  { %1913 = dma.done.wait [#allocation4], 64  }
0x1822   :  { %1914 = vsyncadd [#allocation4], 4294967232 }
0x1823   :  { %1540 = vsyncpa [#allocation3], 1 }
0x1824   :  { %1541 = vsyncpa [#allocation4], 1 }

</bundles_post_ra>
